<compile_context>
chip_gen: v5e
topology: v5e:2x2
jax: 0.10.0
libtpu: 0.0.40
codegen_flags: <defaults>
</compile_context>

<pallas_src>
import jax
import jax.numpy as jnp
from jax.experimental import pallas as pl
from jax.experimental.pallas import tpu as pltpu


_TARGET_TILE_BYTES = 4 * 1024 * 1024   # ~4 MiB DMA tiles -> ~85%+ of HBM roofline


# ----------------------------------------------------------------------------
# Kernels
# ----------------------------------------------------------------------------

def _folded_kernel(x_ref, wblk_ref, bcast_ref, fold_ref, b_ref, o_ref):
    """Lane-dense path: x tile is (bt, T*H).

    wblk:  (T*H, T)  block-diagonal copies of w  -> per-timestep logits
    bcast: (T, T*H)  segment broadcast (e[t] -> H lanes of block t)
    fold:  (T*H, H)  segment sum (fold the T blocks back onto H lanes)
    """
    xf = x_ref[...].astype(jnp.float32)            # single cast (no-op for f32 inputs)
    bias = b_ref[0, 0]                             # scalar bias from SMEM

    # logits[b, t] = <x[b, t*H:(t+1)*H], w> + bias  (one MXU matmul, lane-dense LHS)
    logits = jnp.dot(xf, wblk_ref[...], preferred_element_type=jnp.float32) + bias  # (bt, T)

    # Softmax over time; normalization deferred to the output.
    m = jnp.max(logits, axis=-1, keepdims=True)    # (bt, 1)
    e = jnp.exp(logits - m)                        # (bt, T)
    denom = jnp.sum(e, axis=-1, keepdims=True)     # (bt, 1)

    # Broadcast e over the H lanes of each timestep block, weight x, fold over time.
    e_lanes = jnp.dot(e, bcast_ref[...], preferred_element_type=jnp.float32)      # (bt, T*H)
    ctx = jnp.dot(xf * e_lanes, fold_ref[...], preferred_element_type=jnp.float32)  # (bt, H)

    inv = pl.reciprocal(denom, approx=False)       # EUP; exact to keep 1e-5 tolerance
    o_ref[...] = (ctx * inv).astype(o_ref.dtype)


def _plain_kernel(x_ref, w_ref, b_ref, o_ref):
    """3-D path (H already lane-dense): x tile is (bt, T, H)."""
    xf = x_ref[...].astype(jnp.float32)            # (bt, T, H)
    w = w_ref[...].astype(jnp.float32)             # (1, H)
    bias = b_ref[0, 0]

    # TimeDistributed Linear(H->1): VPU multiply + lane reduce (f32 accumulate).
    logits = jnp.sum(xf * w, axis=-1) + bias       # (bt, T)

    m = jnp.max(logits, axis=-1, keepdims=True)
    e = jnp.exp(logits - m)                        # (bt, T)
    denom = jnp.sum(e, axis=-1, keepdims=True)     # (bt, 1)

    # Unnormalized context; reduction over T stays in f32.
    ctx_un = jnp.sum(xf * e[:, :, None], axis=1)   # (bt, H)

    inv = pl.reciprocal(denom, approx=False)
    o_ref[...] = (ctx_un * inv).astype(o_ref.dtype)


# ----------------------------------------------------------------------------
# Wrapper / tiling logic
# ----------------------------------------------------------------------------

def _round_up(x, m):
    return ((x + m - 1) // m) * m


def _vmem_capacity_bytes():
    try:
        info = pltpu.get_tpu_info()
        for name in ("vmem_capacity_bytes", "vmem_bytes", "vmem_size_bytes"):
            v = getattr(info, name, None)
            if v:
                return int(v)
    except Exception:
        pass
    return 64 * 1024 * 1024   # conservative (v7x-sized) fallback


def _pick_block_rows(B, T, H, elem_bytes, vmem_limit_bytes):
    """Batch rows per grid step: byte-targeted, VMEM-bounded, >=2 grid steps when possible."""
    row_stream = T * H * elem_bytes                        # native bytes streamed per batch row
    # Live VMEM per batch row: 2x double-buffered native input + ~3 f32 temporaries
    # (cast tile, broadcast softmax weights, weighted product) + double-buffered output.
    row_live = 2 * row_stream + 3 * T * H * 4 + 2 * H * max(elem_bytes, 4)
    budget = (vmem_limit_bytes * 3) // 4                   # headroom for constants / scratch
    bt_vmem = budget // max(row_live, 1)
    bt_bw = _TARGET_TILE_BYTES // max(row_stream, 1)
    bt = max(8, min(bt_vmem, bt_bw))
    bt = (bt // 8) * 8                                     # sublane-dense rows
    b_pad8 = _round_up(B, 8)
    if b_pad8 >= 16:
        # Keep >= 2 grid steps so v7x megacore sharding and pipelining have work.
        bt = min(bt, max(8, ((b_pad8 // 2) // 8) * 8))
    bt = min(bt, b_pad8)
    return max(8, bt)


def temporal_attention(x, w, b):
    """x: (B, T, H); w: (H, 1); b: (1,). Returns (B, H)."""
    B, T, H = x.shape
    elem_bytes = jnp.dtype(x.dtype).itemsize

    vmem_cap = _vmem_capacity_bytes()
    # 96 MiB on 128-MiB parts (v5e/v6e), 48 MiB on 64-MiB v7x.
    vmem_limit = min((vmem_cap * 3) // 4, 112 * 1024 * 1024)

    bt = _pick_block_rows(B, T, H, elem_bytes, vmem_limit)
    b_pad = pl.cdiv(B, bt) * bt

    compiler_params = pltpu.CompilerParams(
        dimension_semantics=("parallel",),      # shard batch grid steps across v7x's 2 TCs
        vmem_limit_bytes=int(vmem_limit),
    )
    b_sc = b.reshape(1, 1).astype(jnp.float32)  # scalar bias -> SMEM

    # Lane-dense folded path when H is not a multiple of 128 and the fold
    # constants stay small; otherwise the 3-D layout is already lane-dense.
    fold_const_bytes = T * H * (2 * T + H) * 4
    use_fold = (H % 128 != 0) and (fold_const_bytes <= 4 * 1024 * 1024)

    if use_fold:
        TH = T * H
        x2 = x.reshape(B, TH)                   # free, contiguous reshape
        if b_pad != B:
            # Padded rows are zeros -> uniform softmax -> ctx 0, sliced off below.
            x2 = jnp.pad(x2, ((0, b_pad - B), (0, 0)))

        wf = w.reshape(H, 1).astype(jnp.float32)
        eye_t = jnp.eye(T, dtype=jnp.float32)
        w_blk = jnp.kron(eye_t, wf)                                            # (TH, T)
        bcast = jnp.kron(eye_t, jnp.ones((1, H), jnp.float32))                 # (T, TH)
        foldm = jnp.kron(jnp.ones((T, 1), jnp.float32),
                         jnp.eye(H, dtype=jnp.float32))                        # (TH, H)

        out = pl.pallas_call(
            _folded_kernel,
            out_shape=jax.ShapeDtypeStruct((b_pad, H), x.dtype),
            grid_spec=pltpu.PrefetchScalarGridSpec(
                num_scalar_prefetch=0,
                grid=(b_pad // bt,),
                in_specs=[
                    pl.BlockSpec((bt, TH), lambda i: (i, 0)),            # x batch tile
                    pl.BlockSpec((TH, T), lambda i: (0, 0)),             # block-diag weight
                    pl.BlockSpec((T, TH), lambda i: (0, 0)),             # lane-broadcast matrix
                    pl.BlockSpec((TH, H), lambda i: (0, 0)),             # fold-back matrix
                    pl.BlockSpec(memory_space=pltpu.MemorySpace.SMEM),   # bias scalar
                ],
                out_specs=pl.BlockSpec((bt, H), lambda i: (i, 0)),
            ),
            compiler_params=compiler_params,
        )(x2, w_blk, bcast, foldm, b_sc)
        return out[:B]

    # 3-D path (H multiple of 128, or fold constants too large).
    x3 = x
    if b_pad != B:
        x3 = jnp.pad(x3, ((0, b_pad - B), (0, 0), (0, 0)))
    w_row = w.reshape(1, H).astype(jnp.float32)

    out = pl.pallas_call(
        _plain_kernel,
        out_shape=jax.ShapeDtypeStruct((b_pad, H), x.dtype),
        grid_spec=pltpu.PrefetchScalarGridSpec(
            num_scalar_prefetch=0,
            grid=(b_pad // bt,),
            in_specs=[
                pl.BlockSpec((bt, T, H), lambda i: (i, 0, 0)),
                pl.BlockSpec((1, H), lambda i: (0, 0)),
                pl.BlockSpec(memory_space=pltpu.MemorySpace.SMEM),
            ],
            out_specs=pl.BlockSpec((bt, H), lambda i: (i, 0)),
        ),
        compiler_params=compiler_params,
    )(x3, w_row, b_sc)
    return out[:B]


def temporal_attention_ref(x, w, b):
    logits = jnp.einsum("bth,ho->bto", x, w) + b                  # (B, T, 1)
    attn = jax.nn.softmax(logits, axis=1)                         # softmax over time
    return jnp.sum(x * attn, axis=1)                              # (B, H)


if __name__ == "__main__":
    key = jax.random.PRNGKey(0)
    kx, kw, kb, kx2, kw2, kb2 = jax.random.split(key, 6)

    # --- main test case (H < 128 -> lane-dense folded path) ---
    B, T, H = 2, 8, 32
    x = jax.random.normal(kx, (B, T, H), dtype=jnp.float32)
    bound = 1.0 / (H ** 0.5)
    w = jax.random.uniform(kw, (H, 1), minval=-bound, maxval=bound, dtype=jnp.float32)
    b = jax.random.uniform(kb, (1,), minval=-bound, maxval=bound, dtype=jnp.float32)

    out = jax.block_until_ready(temporal_attention(x, w, b))
    ref = temporal_attention_ref(x, w, b)
    assert out.shape == (B, H)
    assert jnp.allclose(out, ref, atol=1e-5, rtol=1e-5), (
        f"max abs err = {jnp.max(jnp.abs(out - ref))}")

    # --- secondary case (H multiple of 128 -> 3-D path) ---
    B2, T2, H2 = 4, 8, 128
    x2 = jax.random.normal(kx2, (B2, T2, H2), dtype=jnp.float32)
    bound2 = 1.0 / (H2 ** 0.5)
    w2 = jax.random.uniform(kw2, (H2, 1), minval=-bound2, maxval=bound2, dtype=jnp.float32)
    b2 = jax.random.uniform(kb2, (1,), minval=-bound2, maxval=bound2, dtype=jnp.float32)

    out2 = jax.block_until_ready(temporal_attention(x2, w2, b2))
    ref2 = temporal_attention_ref(x2, w2, b2)
    assert out2.shape == (B2, H2)
    assert jnp.allclose(out2, ref2, atol=1e-5, rtol=1e-5), (
        f"max abs err = {jnp.max(jnp.abs(out2 - ref2))}")

    print("KERNEL_OK")
</pallas_src>

<mosaic_0001>
module attributes {stable_mosaic.version = 11 : i64} {
  func.func @_folded_kernel(%arg0: i32, %arg1: memref<8x256xf32, #tpu.memory_space<vmem>>, %arg2: memref<256x8xf32, #tpu.memory_space<vmem>>, %arg3: memref<8x256xf32, #tpu.memory_space<vmem>>, %arg4: memref<256x32xf32, #tpu.memory_space<vmem>>, %arg5: memref<1x1xf32, #tpu.memory_space<smem>>, %arg6: memref<8x32xf32, #tpu.memory_space<vmem>>) attributes {dimension_semantics = [#tpu.dimension_semantics<parallel>], iteration_bounds = array<i64: 1>, scalar_prefetch = 0 : i64, scratch_operands = 0 : i64, tpu.core_type = #tpu.core_type<tc>, window_params = [{transform_indices = @transform_0, window_bounds = array<i64: 8, 256>}, {pipeline_mode = #tpu.pipeline_mode<synchronous>, transform_indices = @transform_1, window_bounds = array<i64: 256, 8>}, {pipeline_mode = #tpu.pipeline_mode<synchronous>, transform_indices = @transform_2, window_bounds = array<i64: 8, 256>}, {pipeline_mode = #tpu.pipeline_mode<synchronous>, transform_indices = @transform_3, window_bounds = array<i64: 256, 32>}, {transform_indices = @transform_4, window_bounds = array<i64: 1, 1>}, {transform_indices = @transform_5, window_bounds = array<i64: 8, 32>}]} {
    %c0 = arith.constant 0 : index
    %c0_0 = arith.constant 0 : index
    %0 = vector.load %arg1[%c0, %c0_0] : memref<8x256xf32, #tpu.memory_space<vmem>>, vector<8x256xf32>
    %c0_1 = arith.constant 0 : index
    %c0_2 = arith.constant 0 : index
    %1 = memref.load %arg5[%c0_1, %c0_2] : memref<1x1xf32, #tpu.memory_space<smem>>
    %c0_3 = arith.constant 0 : index
    %c0_4 = arith.constant 0 : index
    %2 = vector.load %arg2[%c0_3, %c0_4] : memref<256x8xf32, #tpu.memory_space<vmem>>, vector<256x8xf32>
    %cst = arith.constant dense<0.000000e+00> : vector<8x8xf32>
    %3 = tpu.matmul %0, %2, %cst {dimension_numbers = #tpu.dot_dimension_numbers<[1], [0], [0], [1], [0, 0, 1, 1], [], []>} : vector<8x256xf32>, vector<256x8xf32>, vector<8x8xf32> -> vector<8x8xf32>
    %4 = vector.broadcast %1 : f32 to vector<8x8xf32>
    %5 = arith.addf %3, %4 : vector<8x8xf32>
    %cst_5 = arith.constant dense<0xFF800000> : vector<8xf32>
    %6 = vector.multi_reduction <maximumf>, %5, %cst_5 [1] : vector<8x8xf32> to vector<8xf32>
    %7 = vector.shape_cast %6 : vector<8xf32> to vector<8x1xf32>
    %8 = vector.broadcast %7 : vector<8x1xf32> to vector<8x8xf32>
    %9 = arith.subf %5, %8 : vector<8x8xf32>
    %10 = math.exp %9 : vector<8x8xf32>
    %cst_6 = arith.constant dense<0.000000e+00> : vector<8xf32>
    %11 = vector.multi_reduction <add>, %10, %cst_6 [1] : vector<8x8xf32> to vector<8xf32>
    %12 = vector.shape_cast %11 : vector<8xf32> to vector<8x1xf32>
    %c0_7 = arith.constant 0 : index
    %c0_8 = arith.constant 0 : index
    %13 = vector.load %arg3[%c0_7, %c0_8] : memref<8x256xf32, #tpu.memory_space<vmem>>, vector<8x256xf32>
    %cst_9 = arith.constant dense<0.000000e+00> : vector<8x256xf32>
    %14 = tpu.matmul %10, %13, %cst_9 {dimension_numbers = #tpu.dot_dimension_numbers<[1], [0], [0], [1], [0, 0, 1, 1], [], []>} : vector<8x8xf32>, vector<8x256xf32>, vector<8x256xf32> -> vector<8x256xf32>
    %15 = arith.mulf %0, %14 : vector<8x256xf32>
    %c0_10 = arith.constant 0 : index
    %c0_11 = arith.constant 0 : index
    %16 = vector.load %arg4[%c0_10, %c0_11] : memref<256x32xf32, #tpu.memory_space<vmem>>, vector<256x32xf32>
    %cst_12 = arith.constant dense<0.000000e+00> : vector<8x32xf32>
    %17 = tpu.matmul %15, %16, %cst_12 {dimension_numbers = #tpu.dot_dimension_numbers<[1], [0], [0], [1], [0, 0, 1, 1], [], []>} : vector<8x256xf32>, vector<256x32xf32>, vector<8x32xf32> -> vector<8x32xf32>
    %18 = tpu.reciprocal %12 : vector<8x1xf32> -> vector<8x1xf32>
    %19 = vector.broadcast %18 : vector<8x1xf32> to vector<8x32xf32>
    %20 = arith.mulf %17, %19 : vector<8x32xf32>
    %c0_13 = arith.constant 0 : index
    %c0_14 = arith.constant 0 : index
    %21 = vector.load %arg6[%c0_13, %c0_14] : memref<8x32xf32, #tpu.memory_space<vmem>>, vector<8x32xf32>
    tpu.vector_store %arg6[%c0_13, %c0_14], %20 {strides = array<i32>} : memref<8x32xf32, #tpu.memory_space<vmem>>, vector<8x32xf32>,
    return
  }
  func.func @transform_0(%arg0: i32) -> (i32, i32) {
    %c0_i32 = arith.constant 0 : i32
    %c0_i32_0 = arith.constant 0 : i32
    return %arg0, %c0_i32 : i32, i32
  }
  func.func @transform_1(%arg0: i32) -> (i32, i32) {
    %c0_i32 = arith.constant 0 : i32
    %c0_i32_0 = arith.constant 0 : i32
    %c0_i32_1 = arith.constant 0 : i32
    return %c0_i32, %c0_i32_0 : i32, i32
  }
  func.func @transform_2(%arg0: i32) -> (i32, i32) {
    %c0_i32 = arith.constant 0 : i32
    %c0_i32_0 = arith.constant 0 : i32
    %c0_i32_1 = arith.constant 0 : i32
    return %c0_i32, %c0_i32_0 : i32, i32
  }
  func.func @transform_3(%arg0: i32) -> (i32, i32) {
    %c0_i32 = arith.constant 0 : i32
    %c0_i32_0 = arith.constant 0 : i32
    %c0_i32_1 = arith.constant 0 : i32
    return %c0_i32, %c0_i32_0 : i32, i32
  }
  func.func @transform_4(%arg0: i32) -> (i32, i32) {
    %c0_i32 = arith.constant 0 : i32
    %c0_i32_0 = arith.constant 0 : i32
    %c0_i32_1 = arith.constant 0 : i32
    return %c0_i32, %c0_i32_0 : i32, i32
  }
  func.func @transform_5(%arg0: i32) -> (i32, i32) {
    %c0_i32 = arith.constant 0 : i32
    %c0_i32_0 = arith.constant 0 : i32
    return %arg0, %c0_i32 : i32, i32
  }
}

</mosaic_0001>

<bundles_post_ra>
// kernel: tpu_custom_call.1
= control target key start
LH: loop header
LB: loop body
LE: loop exit
PB: predicated region body
PF: predicated region fallthrough
CT: control target
= control target key end

     0   :  { %s546_s0 = inlined_call_operand.vmem [shape: f32[8,256], index: 0, kind: input, shape index: {}]   ;;  %s547_s1 = inlined_call_operand.vmem [shape: f32[256,8], index: 1, kind: input, shape index: {}]   ;;  %s548_s2 = inlined_call_operand.vmem [shape: f32[8,256], index: 2, kind: input, shape index: {}]   ;;  %s549_s3 = inlined_call_operand.vmem [shape: f32[256,32], index: 3, kind: input, shape index: {}]   ;;  %s550_s4 = inlined_call_operand.<no memory space> [shape: f32[1,1], index: 4, kind: input, shape index: {}]   ;;  %s551_s5 = inlined_call_operand.hbm [shape: f32[8,32], index: 5, kind: output, shape index: {}]  }
   0x1   :  { %v40_v0 = vld [vmem:[%s547_s1 + $0x78] sm:$0xff]  ;;  %v39_v1 = vld [vmem:[%s547_s1 + $0x70] sm:$0xff]  ;;  %v38_v4 = vld [vmem:[%s547_s1 + $0x68] sm:$0xff] }
   0x2   :  { %v56_v2 = vld [vmem:[%s547_s1 + $0xf8] sm:$0xff]  ;;  %58 = vmatpush.msra.mxu0 %v40_v0  ;;  %v55_v3 = vld [vmem:[%s547_s1 + $0xf0] sm:$0xff]  ;;  %v54_v5 = vld [vmem:[%s547_s1 + $0xe8] sm:$0xff] }
   0x3   :  { %78 = vmatpush.msra.mxu1 %v56_v2  ;;  %v37_v6 = vld [vmem:[%s547_s1 + $0x60] sm:$0xff]  ;;  %v36_v8 = vld [vmem:[%s547_s1 + $0x58] sm:$0xff]  ;;  %v35_v10 = vld [vmem:[%s547_s1 + $0x50] sm:$0xff] }
   0x4   :  { %59 = vmatpush.msra.mxu0 %v39_v1  ;;  %v53_v7 = vld [vmem:[%s547_s1 + $0xe0] sm:$0xff]  ;;  %v52_v9 = vld [vmem:[%s547_s1 + $0xd8] sm:$0xff]  ;;  %v51_v11 = vld [vmem:[%s547_s1 + $0xd0] sm:$0xff] }
   0x5   :  { %79 = vmatpush.msra.mxu1 %v55_v3  ;;  %v34_v12 = vld [vmem:[%s547_s1 + $0x48] sm:$0xff] }
   0x6   :  { %60 = vmatpush.msra.mxu0 %v38_v4  ;;  %v50_v13 = vld [vmem:[%s547_s1 + $0xc8] sm:$0xff] }
   0x7   :  { %80 = vmatpush.msra.mxu1 %v54_v5 }
   0x8   :  { %61 = vmatpush.msra.mxu0 %v37_v6 }
   0x9   :  { %81 = vmatpush.msra.mxu1 %v53_v7 }
   0xa   :  { %62 = vmatpush.msra.mxu0 %v36_v8 }
   0xb   :  { %82 = vmatpush.msra.mxu1 %v52_v9 }
   0xc   :  { %63 = vmatpush.msra.mxu0 %v35_v10 }
   0xd   :  { %83 = vmatpush.msra.mxu1 %v51_v11 }
   0xe   :  { %11 = vsyncpa [#allocation4], 0  ;;  %v33_v14 = vld [vmem:[%s547_s1 + $0x40] sm:$0xff]  ;;  %64 = vmatpush.msra.mxu0 %v34_v12  ;;  %v32_v16 = vld [vmem:[%s547_s1 + $0x38] sm:$0xff]  ;;  %v57_v34 = vstv %s550_s4  ;;  %vm98_vm0 = vcmask 64512   ;;  %s251_s22 = sshll.u32 %s551_s5, 4  ;;  %s252_s22 = int_to_ptr.hbm [resolvable:$true] %s251_s22 }
   0xf   :  { %v49_v15 = vld [vmem:[%s547_s1 + $0xc0] sm:$0xff]  ;;  %84 = vmatpush.msra.mxu1 %v50_v13  ;;  %v48_v17 = vld [vmem:[%s547_s1 + $0xb8] sm:$0xff]  ;;  %v31_v18 = vld [vmem:[%s547_s1 + $0x30] sm:$0xff]  ;;  %vm242_vm5 = vcmask 261120  }
  0x10   :  { %65 = vmatpush.msra.mxu0 %v33_v14  ;;  %v47_v19 = vld [vmem:[%s547_s1 + $0xb0] sm:$0xff]  ;;  %v30_v20 = vld [vmem:[%s547_s1 + $0x28] sm:$0xff]  ;;  %v29_v22 = vld [vmem:[%s547_s1 + $0x20] sm:$0xff] }
  0x11   :  { %85 = vmatpush.msra.mxu1 %v49_v15  ;;  %v46_v21 = vld [vmem:[%s547_s1 + $0xa8] sm:$0xff]  ;;  %v45_v23 = vld [vmem:[%s547_s1 + $0xa0] sm:$0xff]  ;;  %v28_v24 = vld [vmem:[%s547_s1 + $0x18] sm:$0xff] }
  0x12   :  { %66 = vmatpush.msra.mxu0 %v32_v16  ;;  %v44_v25 = vld [vmem:[%s547_s1 + $0x98] sm:$0xff]  ;;  %v27_v26 = vld [vmem:[%s547_s1 + $0x10] sm:$0xff]  ;;  %v26_v28 = vld [vmem:[%s547_s1 + $0x8] sm:$0xff] }
  0x13   :  { %86 = vmatpush.msra.mxu1 %v48_v17  ;;  %v43_v27 = vld [vmem:[%s547_s1 + $0x90] sm:$0xff]  ;;  %v42_v29 = vld [vmem:[%s547_s1 + $0x88] sm:$0xff]  ;;  %v25_v30 = vld [vmem:[%s547_s1] sm:$0xff] }
  0x14   :  { %67 = vmatpush.msra.mxu0 %v31_v18  ;;  %v41_v31 = vld [vmem:[%s547_s1 + $0x80] sm:$0xff]  ;;  %v428_v33 = vld [vmem:[%s546_s0 + $0x8] sm:$0xff]  ;;  %v170_v42 = vld [vmem:[%s549_s3 + $0x78] sm:$0xff] }
  0x15   :  { %87 = vmatpush.msra.mxu1 %v47_v19  ;;  %v423_v32 = vld [vmem:[%s546_s0] sm:$0xff]  ;;  %v109_v41 = vld [vmem:[%s548_s2 + $0x8] sm:$0xff]  ;;  %v186_v43 = vld [vmem:[%s549_s3 + $0xf8] sm:$0xff] }
  0x16   :  { %68 = vmatpush.msra.mxu0 %v30_v20  ;;  %v108_v40 = vld [vmem:[%s548_s2] sm:$0xff]  ;;  %148 = vmatpush.msra.mxu3 %v109_v41  ;;  %v169_v44 = vld [vmem:[%s549_s3 + $0x70] sm:$0xff]  ;;  %v168_v46 = vld [vmem:[%s549_s3 + $0x68] sm:$0xff] }
  0x17   :  { %88 = vmatpush.msra.mxu1 %v46_v21  ;;  %128 = vmatpush.msra.mxu2 %v108_v40  ;;  %v185_v45 = vld [vmem:[%s549_s3 + $0xf0] sm:$0xff]  ;;  %v184_v47 = vld [vmem:[%s549_s3 + $0xe8] sm:$0xff]  ;;  %v167_v48 = vld [vmem:[%s549_s3 + $0x60] sm:$0xff] }
  0x18   :  { %69 = vmatpush.msra.mxu0 %v29_v22  ;;  %207 = vmatpush.msrb.mxu3 %v186_v43  ;;  %v183_v49 = vld [vmem:[%s549_s3 + $0xe0] sm:$0xff]  ;;  %v166_v50 = vld [vmem:[%s549_s3 + $0x58] sm:$0xff]  ;;  %v165_v52 = vld [vmem:[%s549_s3 + $0x50] sm:$0xff] }
  0x19   :  { %89 = vmatpush.msra.mxu1 %v45_v23  ;;  %187 = vmatpush.msrb.mxu2 %v170_v42  ;;  %v182_v51 = vld [vmem:[%s549_s3 + $0xd8] sm:$0xff]  ;;  %v181_v53 = vld [vmem:[%s549_s3 + $0xd0] sm:$0xff]  ;;  %v164_v54 = vld [vmem:[%s549_s3 + $0x48] sm:$0xff] }
  0x1a   :  { %70 = vmatpush.msra.mxu0 %v28_v24  ;;  %208 = vmatpush.msrb.mxu3 %v185_v45  ;;  %v180_v55 = vld [vmem:[%s549_s3 + $0xc8] sm:$0xff]  ;;  %v163_v61 = vld [vmem:[%s549_s3 + $0x40] sm:$0xff]  ;;  %v162_v63 = vld [vmem:[%s549_s3 + $0x38] sm:$0xff] }
  0x1b   :  { %90 = vmatpush.msra.mxu1 %v44_v25  ;;  %188 = vmatpush.msrb.mxu2 %v169_v44  ;;  %v179_v62 = vld [vmem:[%s549_s3 + $0xc0] sm:$0xff]  ;;  %v178_v0 = vld [vmem:[%s549_s3 + $0xb8] sm:$0xff]  ;;  %v161_v1 = vld [vmem:[%s549_s3 + $0x30] sm:$0xff] }
  0x1c   :  { %71 = vmatpush.msra.mxu0 %v27_v26  ;;  %209 = vmatpush.msrb.mxu3 %v184_v47  ;;  %v177_v2 = vld [vmem:[%s549_s3 + $0xb0] sm:$0xff]  ;;  %v160_v3 = vld [vmem:[%s549_s3 + $0x28] sm:$0xff]  ;;  %v159_v5 = vld [vmem:[%s549_s3 + $0x20] sm:$0xff] }
  0x1d   :  { %91 = vmatpush.msra.mxu1 %v43_v27  ;;  %189 = vmatpush.msrb.mxu2 %v168_v46  ;;  %v176_v4 = vld [vmem:[%s549_s3 + $0xa8] sm:$0xff]  ;;  %v175_v6 = vld [vmem:[%s549_s3 + $0xa0] sm:$0xff]  ;;  %v158_v7 = vld [vmem:[%s549_s3 + $0x18] sm:$0xff] }
  0x1e   :  { %72 = vmatpush.msra.mxu0 %v26_v28  ;;  %210 = vmatpush.msrb.mxu3 %v183_v49  ;;  %v174_v8 = vld [vmem:[%s549_s3 + $0x98] sm:$0xff]  ;;  %v157_v9 = vld [vmem:[%s549_s3 + $0x10] sm:$0xff]  ;;  %v156_v11 = vld [vmem:[%s549_s3 + $0x8] sm:$0xff] }
  0x1f   :  { %92 = vmatpush.msra.mxu1 %v42_v29  ;;  %190 = vmatpush.msrb.mxu2 %v167_v48  ;;  %v173_v10 = vld [vmem:[%s549_s3 + $0x90] sm:$0xff]  ;;  %v172_v12 = vld [vmem:[%s549_s3 + $0x88] sm:$0xff]  ;;  %v155_v13 = vld [vmem:[%s549_s3] sm:$0xff] }
  0x20   :  { %73 = vmatpush.msra.mxu0 %v25_v30  ;;  %211 = vmatpush.msrb.mxu3 %v182_v51  ;;  %v171_v14 = vld [vmem:[%s549_s3 + $0x80] sm:$0xff]  ;;  %s293_s3 = smov [#allocation3]  }
  0x21   :  { %93 = vmatpush.msra.mxu1 %v41_v31  ;;  %74 = vmatmul.f32.vlgmr.msra.gmra.mxu0 %v423_v32  ;;  %s249_s20 = sshll.u32 %s293_s3, 4  ;;  %s250_s20 = int_to_ptr.vmem [resolvable:$true] %s249_s20 }
  0x22   :  { %94 = vmatmul.f32.vlgmr.msra.gmra.mxu1 %v428_v33  ;;  %191 = vmatpush.msrb.mxu2 %v166_v50 }
  0x23   :  { %212 = vmatpush.msrb.mxu3 %v181_v53 }
  0x24   :  { %192 = vmatpush.msrb.mxu2 %v165_v52 }
  0x25   :  { %213 = vmatpush.msrb.mxu3 %v180_v55 }
  0x26   :  { %193 = vmatpush.msrb.mxu2 %v164_v54 }
  0x27   :  { %214 = vmatpush.msrb.mxu3 %v179_v62 }
  0x28   :  { %194 = vmatpush.msrb.mxu2 %v163_v61 }
  0x29   :  { %215 = vmatpush.msrb.mxu3 %v178_v0 }
  0x2a   :  { %195 = vmatpush.msrb.mxu2 %v162_v63 }
  0x2b   :  { %216 = vmatpush.msrb.mxu3 %v177_v2 }
  0x2c   :  { %196 = vmatpush.msrb.mxu2 %v161_v1 }
  0x2d   :  { %217 = vmatpush.msrb.mxu3 %v176_v4 }
  0x2e   :  { %197 = vmatpush.msrb.mxu2 %v160_v3 }
  0x2f   :  { %218 = vmatpush.msrb.mxu3 %v175_v6 }
  0x30   :  { %198 = vmatpush.msrb.mxu2 %v159_v5 }
  0x31   :  { %219 = vmatpush.msrb.mxu3 %v174_v8 }
  0x32   :  { %199 = vmatpush.msrb.mxu2 %v158_v7 }
  0x33   :  { %220 = vmatpush.msrb.mxu3 %v173_v10 }
  0x34   :  { %200 = vmatpush.msrb.mxu2 %v157_v9 }
  0x35   :  { %221 = vmatpush.msrb.mxu3 %v172_v12 }
  0x36   :  { %201 = vmatpush.msrb.mxu2 %v156_v11 }
  0x37   :  { %222 = vmatpush.msrb.mxu3 %v171_v14 }
  0x38   :  { %202 = vmatpush.msrb.mxu2 %v155_v13 }
  0x9e   :  { %v75_v35 = vpop.f32.mrf.mxu0 }
  0x9f   :  { %v95_v36 = vpop.f32.mrf.mxu1  ;;  %v76_v37 = vadd.f32 %v75_v35, %v57_v34 }
  0xa1   :  { %v96_v38 = vadd.f32 %v95_v36, %v76_v37 }
  0xa3   :  { %v99_v39 = vsel %vm98_vm0, %v96_v38, -inf }
  0xa4   :  { %100 = vmax.xlane.f32.xlu0 %v99_v39 }
 0x117   :  { %v101_v56 = vpop.xlane.xlu0 %100 }
 0x118   :  { %v102_v57 = vsub.f32 %v96_v38, %v101_v56 }
 0x11a   :  { %v103_v58 = vmul.f32 1.442695, %v102_v57 }
 0x11c   :  { %263 = vpow2.f32 %v103_v58 }
 0x122   :  { %v264_v59 = vpop.eup %263 }
 0x123   :  { %260 = vmatmul.msk.f32.vlgmr.msra.gmra.mxu2 %vm98_vm0, %v264_v59  ;;  %261 = vmatmul.msk.f32.vlgmr.msra.gmra.mxu3 %vm98_vm0, %v264_v59  ;;  %v105_v60 = vsel %vm98_vm0, %v264_v59, 0.0 }
 0x124   :  { %106 = vadd.xlane.f32.xlu0 %v105_v60 }
 0x197   :  { %v107_v19 = vpop.xlane.xlu0 %106 }
 0x198   :  { %265 = vrcp.f32 %v107_v19  ;;  %v238_v25 = vand.u32 2147483648, %v107_v19  ;;  %vm232_vm2 = vweird.f32 %v107_v19  ;;  %v236_v26 = vand.u32 2147483647, %v107_v19 }
 0x19a   :  { %v239_v28 = vor.u32 1.1754944e-38, %v238_v25  ;;  %vm237_vm4 = vcmp.eq.f32.partialorder %v236_v26, 8.507059e+37 }
 0x19e   :  { %v266_v20 = vpop.eup %265 }
 0x19f   :  { %v228_v21 = vmul.f32 %v266_v20, %v107_v19  ;;  %vm233_vm1 = vweird.f32 %v266_v20 }
 0x1a0   :  { %vm234_vm3 = vmor %vm232_vm2, %vm233_vm1 }
 0x1a1   :  { %v229_v22 = vsub.f32 1.0, %v228_v21 }
 0x1a3   :  { %v230_v23 = vmul.f32 %v266_v20, %v229_v22 }
 0x1a5   :  { %v231_v24 = vadd.f32 %v266_v20, %v230_v23 }
 0x1a6   :  { %v130_v15 = vpop.f32.mrf.mxu2  ;;  %v150_v16 = vpop.f32.mrf.mxu3 }
 0x1a7   :  { %v153_v17 = vmul.f32 %v130_v15, %v423_v32  ;;  %v154_v18 = vmul.f32 %v150_v16, %v428_v33  ;;  %v235_v27 = vsel %vm234_vm3, %v266_v20, %v231_v24 }
 0x1a8   :  { %v240_v32 = vsel %vm237_vm4, %v239_v28, %v235_v27 }
 0x1a9   :  { %203 = vmatmul.f32.vlgmr.msrb.gmra.mxu2 %v153_v17  ;;  %223 = vmatmul.f32.vlgmr.msrb.gmra.mxu3 %v154_v18 }
 0x22c   :  { %v204_v29 = vpop.f32.mrf.mxu2  ;;  %v224_v30 = vpop.f32.mrf.mxu3 }
 0x22d   :  { %v225_v31 = vadd.f32 %v224_v30, %v204_v29 }
 0x22f   :  { %v241_v33 = vmul.f32 %v240_v32, %v225_v31 }
 0x231   :  { %243 = vst.msk [vmem:[#allocation3] sm:$0xff] %vm242_vm5, %v241_v33 }
 0x232   :  { %254 = dma.vmem_to_hbm [thread:$0]  %s250_s20, 128, %s252_s22, [#allocation4]  }
 0x233   :  { %291 = dma.done.wait [#allocation4], 128  }
 0x234   :  { %292 = vsyncadd [#allocation4], 4294967168 }
 0x235   :  { %259 = vsyncpa [#allocation4], 1 }

</bundles_post_ra>
